<compile_context>
chip_gen: v5e
topology: v5e:2x2
jax: 0.10.0
libtpu: 0.0.40
codegen_flags: <defaults>
</compile_context>

<pallas_src>
import functools
import math

import jax
import jax.numpy as jnp
from jax.experimental import pallas as pl
from jax.experimental.pallas import tpu as pltpu

EPS = 1e-5
EXPANSION = 4  # Bottleneck expansion (ResNet50)

_VMEM_FULL = pl.BlockSpec(memory_space=pltpu.MemorySpace.VMEM)


def _vmem_limit_bytes():
  """<=75% of physical VMEM (=> ~48 MiB on v7x), capped at 96 MiB (v5e/v6e)."""
  try:
    cap = pltpu.get_tpu_info().vmem_capacity_bytes
    return max(32 * 1024 * 1024, min(int(cap) * 3 // 4, 96 * 1024 * 1024))
  except Exception:
    return None  # fall back to the compiler default


_VMEM_LIMIT = _vmem_limit_bytes()


def _cp(dims=None):
  return pltpu.CompilerParams(dimension_semantics=dims,
                              vmem_limit_bytes=_VMEM_LIMIT)


def _round_up(x, m):
  return ((x + m - 1) // m) * m


def _cpad(c):
  """Pad a channel count to a multiple of 128 (lane-dense stores)."""
  return _round_up(max(c, 128), 128)


def _pick_tk(k):
  if k <= 1024:
    return k
  for cand in (512, 384, 256, 128):
    if k % cand == 0:
      return cand
  return k


def _pick_tn(cout):
  return 256 if cout % 256 == 0 else 128


def _pick_tm_rows(m, c, cap=512, target_bytes=1 << 20):
  t = min(cap, max(8, target_bytes // max(1, 2 * c)))
  t = max(8, (t // 8) * 8)
  if m <= t:
    return _round_up(m, 8)
  return t


# ----------------------------------------------------------------------------
# Pallas kernels
# ----------------------------------------------------------------------------
def _matmul_kernel(x_ref, w_ref, o_ref, acc_ref):
  """Tiled bf16 matmul, f32 VMEM accumulator, K is the innermost grid axis."""
  @pl.when(pl.program_id(2) == 0)
  def _():
    acc_ref[...] = jnp.zeros_like(acc_ref)

  acc_ref[...] += jnp.dot(x_ref[...], w_ref[...],
                          preferred_element_type=jnp.float32)

  @pl.when(pl.program_id(2) == pl.num_programs(2) - 1)
  def _():
    o_ref[...] = acc_ref[...].astype(o_ref.dtype)


def _conv3x3_s1_kernel(x_ref, w_ref, o_ref, *, ho_out, wo_out):
  """Direct 3x3 / stride-1 conv: 9-tap matmul accumulation, one output row at
  a time, no host-side im2col.
  x_ref: (1, Hp, Wp, Cin) bf16; w_ref: (3, 3, Cin, tn) bf16;
  o_ref: (1, Ho, Wo, tn) bf16."""
  tn = o_ref.shape[-1]

  def body(ho, carry):
    acc = jnp.zeros((wo_out, tn), jnp.float32)
    for dh in range(3):
      for dw in range(3):
        lhs = x_ref[0, ho + dh, pl.ds(dw, wo_out), :]          # (Wo, Cin)
        acc = acc + jnp.dot(lhs, w_ref[dh, dw],
                            preferred_element_type=jnp.float32)
    o_ref[0, ho] = acc.astype(o_ref.dtype)
    return carry

  jax.lax.fori_loop(0, ho_out, body, 0)
  # TODO(synk): pack several output rows per MXU call to raise MXU utilization.


def _bn_stats_kernel(y_ref, stats_ref):
  """Accumulate per-channel [sum; sum_sq] over M (grid reduction, f32)."""
  i = pl.program_id(0)
  y = y_ref[...].astype(jnp.float32)
  part = jnp.concatenate([jnp.sum(y, axis=0, keepdims=True),
                          jnp.sum(y * y, axis=0, keepdims=True)], axis=0)

  @pl.when(i == 0)
  def _():
    stats_ref[...] = part

  @pl.when(i > 0)
  def _():
    stats_ref[...] += part


def _bn_apply_kernel(y_ref, stats_ref, gamma_ref, beta_ref, *rest,
                     inv_m, eps, relu, has_res):
  """Training-mode BN (batch stats) + optional residual + optional ReLU."""
  if has_res:
    res_ref, o_ref = rest
  else:
    (o_ref,) = rest
  mean = stats_ref[0:1, :] * inv_m
  var = jnp.maximum(stats_ref[1:2, :] * inv_m - mean * mean, 0.0)
  scale = gamma_ref[...] * jax.lax.rsqrt(var + eps)
  shift = beta_ref[...] - mean * scale
  y = y_ref[...].astype(jnp.float32) * scale + shift
  if has_res:
    y = y + res_ref[...].astype(jnp.float32)
  if relu:
    y = jnp.maximum(y, 0.0)
  o_ref[...] = y.astype(o_ref.dtype)


def _maxpool_direct_kernel(x_ref, o_ref):
  """3x3/stride-2 max pool: 9 strided taps read from the padded image block."""
  ho, wo = o_ref.shape[1], o_ref.shape[2]
  r = None
  for dh in range(3):
    for dw in range(3):
      tap = x_ref[0, pl.ds(dh, ho, 2), pl.ds(dw, wo, 2), :]
      r = tap if r is None else jnp.maximum(r, tap)
  o_ref[0] = r


def _maxpool_taps_kernel(x_ref, o_ref):
  o_ref[...] = jnp.max(x_ref[...], axis=0)


def _avgpool_fc_kernel(x_ref, w_ref, b_ref, o_ref, *, inv_hw):
  pooled = jnp.sum(x_ref[...].astype(jnp.float32), axis=1) * inv_hw  # (N, C)
  o_ref[...] = (jnp.dot(pooled, w_ref[...],
                        preferred_element_type=jnp.float32) + b_ref[...])


# ----------------------------------------------------------------------------
# Kernel wrappers
# ----------------------------------------------------------------------------
def matmul_bf16(x2d, w2d):
  """(M, K) @ (K, Cout) -> (M, Cout) bf16, tiled + pipelined, f32 accumulate."""
  m, k = x2d.shape
  cout = w2d.shape[1]
  x2d = x2d.astype(jnp.bfloat16)
  w2d = w2d.astype(jnp.bfloat16)
  kp = _round_up(k, 8)                      # e.g. stem K=27 -> 32
  if kp != k:
    x2d = jnp.pad(x2d, ((0, 0), (0, kp - k)))
    w2d = jnp.pad(w2d, ((0, kp - k), (0, 0)))
  tm = 512 if m >= 512 else _round_up(m, 8)
  mp = _round_up(m, tm)
  if mp != m:
    x2d = jnp.pad(x2d, ((0, mp - m), (0, 0)))
  tn = _pick_tn(cout)
  tk = _pick_tk(kp)
  grid = (mp // tm, cout // tn, kp // tk)
  y = pl.pallas_call(
      _matmul_kernel,
      out_shape=jax.ShapeDtypeStruct((mp, cout), jnp.bfloat16),
      grid_spec=pltpu.PrefetchScalarGridSpec(
          num_scalar_prefetch=0, grid=grid,
          in_specs=[pl.BlockSpec((tm, tk), lambda i, j, kk: (i, kk)),
                    pl.BlockSpec((tk, tn), lambda i, j, kk: (kk, j))],
          out_specs=pl.BlockSpec((tm, tn), lambda i, j, kk: (i, j)),
          scratch_shapes=[pltpu.VMEM((tm, tn), jnp.float32)]),
      compiler_params=_cp(("parallel", "parallel", "arbitrary")),
  )(x2d, w2d)
  return y[:m] if mp != m else y


def bn_relu_residual(y2d, gamma, beta, *, relu, residual=None):
  """Training-mode BatchNorm over the rows of y2d (per channel), fused with
  residual add + ReLU.  Two tiled passes: stats reduction, then apply."""
  m, c = y2d.shape
  tm = _pick_tm_rows(m, c)
  mp = _round_up(m, tm)
  yp = jnp.pad(y2d, ((0, mp - m), (0, 0))) if mp != m else y2d
  grid = (mp // tm,)

  stats = pl.pallas_call(
      _bn_stats_kernel,
      out_shape=jax.ShapeDtypeStruct((2, c), jnp.float32),
      grid_spec=pltpu.PrefetchScalarGridSpec(
          num_scalar_prefetch=0, grid=grid,
          in_specs=[pl.BlockSpec((tm, c), lambda i: (i, 0))],
          out_specs=pl.BlockSpec((2, c), lambda i: (0, 0))),
      compiler_params=_cp(("arbitrary",)),
  )(yp)

  args = [yp, stats, gamma, beta]
  in_specs = [pl.BlockSpec((tm, c), lambda i: (i, 0)),
              pl.BlockSpec((2, c), lambda i: (0, 0)),
              pl.BlockSpec((1, c), lambda i: (0, 0)),
              pl.BlockSpec((1, c), lambda i: (0, 0))]
  if residual is not None:
    rp = residual.astype(jnp.bfloat16)
    if mp != m:
      rp = jnp.pad(rp, ((0, mp - m), (0, 0)))
    args.append(rp)
    in_specs.append(pl.BlockSpec((tm, c), lambda i: (i, 0)))

  kernel = functools.partial(_bn_apply_kernel, inv_m=1.0 / m, eps=EPS,
                             relu=relu, has_res=residual is not None)
  out = pl.pallas_call(
      kernel,
      out_shape=jax.ShapeDtypeStruct((mp, c), jnp.bfloat16),
      grid_spec=pltpu.PrefetchScalarGridSpec(
          num_scalar_prefetch=0, grid=grid,
          in_specs=in_specs,
          out_specs=pl.BlockSpec((tm, c), lambda i: (i, 0))),
      compiler_params=_cp(("parallel",)),
  )(*args)
  return out[:m] if mp != m else out


def im2col(x, kh, kw, stride, pad):
  """Patch matrix; only used for stride-2 3x3 convs and the Cin=3 stem conv."""
  n, h, w, c = x.shape
  xp = jnp.pad(x, ((0, 0), (pad, pad), (pad, pad), (0, 0)))
  ho = (h + 2 * pad - kh) // stride + 1
  wo = (w + 2 * pad - kw) // stride + 1
  cols = []
  for dh in range(kh):
    for dw in range(kw):
      cols.append(xp[:, dh:dh + stride * (ho - 1) + 1:stride,
                     dw:dw + stride * (wo - 1) + 1:stride, :])
  return jnp.concatenate(cols, axis=-1), ho, wo


def _conv3x3_direct_call(xp, w, ho, wo):
  n, hp, wp, cin = xp.shape
  cout = w.shape[-1]
  tn = cout if cout <= 512 else (512 if cout % 512 == 0 else 256)
  kernel = functools.partial(_conv3x3_s1_kernel, ho_out=ho, wo_out=wo)
  return pl.pallas_call(
      kernel,
      out_shape=jax.ShapeDtypeStruct((n, ho, wo, cout), jnp.bfloat16),
      grid_spec=pltpu.PrefetchScalarGridSpec(
          num_scalar_prefetch=0, grid=(n, cout // tn),
          in_specs=[pl.BlockSpec((1, hp, wp, cin), lambda b, j: (b, 0, 0, 0)),
                    pl.BlockSpec((3, 3, cin, tn), lambda b, j: (0, 0, 0, j))],
          out_specs=pl.BlockSpec((1, ho, wo, tn), lambda b, j: (b, 0, 0, j))),
      compiler_params=_cp(("parallel", "parallel")),
  )(xp, w)


def conv3x3(x, w, *, stride, pad):
  """3x3 conv -> flattened (M, Cout) pre-BN output.  Stride-1 convs with
  lane-aligned channels use the direct 9-tap kernel; otherwise im2col."""
  n, h, w_in, cin = x.shape
  cout = w.shape[-1]
  ho = (h + 2 * pad - 3) // stride + 1
  wo = (w_in + 2 * pad - 3) // stride + 1
  if stride == 1 and cin % 128 == 0:
    xp = jnp.pad(x.astype(jnp.bfloat16),
                 ((0, 0), (pad, pad), (pad, pad), (0, 0)))
    try:
      y4 = _conv3x3_direct_call(xp, w, ho, wo)
      return y4.reshape(n * ho * wo, cout), ho, wo
    except Exception:
      pass  # direct kernel did not lower on this toolchain -> im2col fallback
  xm, ho, wo = im2col(x, 3, 3, stride, pad)
  y2 = matmul_bf16(xm.reshape(n * ho * wo, 9 * cin), w.reshape(9 * cin, cout))
  return y2, ho, wo


def conv_bn_act(x, w, bn, *, stride, pad, relu=True, residual=None):
  """conv (bias dropped; exactly cancelled by training-mode BN) + BN +
  (residual) + (ReLU).  x: NHWC activation (channels padded to 128s);
  w: (kh, kw, Cin, Cout) bf16 with zero-padded channel blocks."""
  n = x.shape[0]
  kh, _, _, cout = w.shape
  if kh == 1:
    xs = x if stride == 1 else x[:, ::stride, ::stride, :]
    ho, wo = xs.shape[1], xs.shape[2]
    y2d = matmul_bf16(xs.reshape(n * ho * wo, xs.shape[3]),
                      w.reshape(w.shape[2], cout))
  else:
    y2d, ho, wo = conv3x3(x, w, stride=stride, pad=pad)
  res2d = None if residual is None else residual.reshape(n * ho * wo, cout)
  out2d = bn_relu_residual(y2d, bn["gamma"], bn["beta"],
                           relu=relu, residual=res2d)
  return out2d.reshape(n, ho, wo, cout)


def maxpool_3x3_s2_p1(x):
  """nn.MaxPool2d(kernel_size=3, stride=2, padding=1) on NHWC."""
  n, h, w, c = x.shape
  ho = (h - 1) // 2 + 1
  wo = (w - 1) // 2 + 1
  xp = jnp.pad(x, ((0, 0), (1, 1), (1, 1), (0, 0)),
               constant_values=-jnp.inf)
  try:
    return pl.pallas_call(
        _maxpool_direct_kernel,
        out_shape=jax.ShapeDtypeStruct((n, ho, wo, c), x.dtype),
        grid_spec=pltpu.PrefetchScalarGridSpec(
            num_scalar_prefetch=0, grid=(n,),
            in_specs=[pl.BlockSpec((1, h + 2, w + 2, c),
                                   lambda b: (b, 0, 0, 0))],
            out_specs=pl.BlockSpec((1, ho, wo, c), lambda b: (b, 0, 0, 0))),
        compiler_params=_cp(("parallel",)),
    )(xp)
  except Exception:
    pass  # strided in-kernel taps unavailable -> stacked-window fallback
  wins = []
  for dh in range(3):
    for dw in range(3):
      wins.append(xp[:, dh:dh + 2 * ho - 1:2,
                     dw:dw + 2 * wo - 1:2, :].reshape(n * ho * wo, c))
  stacked = jnp.stack(wins, axis=0)
  m = n * ho * wo
  tm = _pick_tm_rows(m, c)
  mp = _round_up(m, tm)
  if mp != m:
    stacked = jnp.pad(stacked, ((0, 0), (0, mp - m), (0, 0)))
  out = pl.pallas_call(
      _maxpool_taps_kernel,
      out_shape=jax.ShapeDtypeStruct((mp, c), x.dtype),
      grid_spec=pltpu.PrefetchScalarGridSpec(
          num_scalar_prefetch=0, grid=(mp // tm,),
          in_specs=[pl.BlockSpec((9, tm, c), lambda i: (0, i, 0))],
          out_specs=pl.BlockSpec((tm, c), lambda i: (i, 0))),
      compiler_params=_cp(("parallel",)),
  )(stacked)
  return out[:m].reshape(n, ho, wo, c)


def avgpool_fc(x, fc_w, fc_b):
  """Fused AdaptiveAvgPool2d((1,1)) + Linear (class dim padded to 128)."""
  n, h, w, c = x.shape
  kernel = functools.partial(_avgpool_fc_kernel, inv_hw=1.0 / (h * w))
  return pl.pallas_call(
      kernel,
      out_shape=jax.ShapeDtypeStruct((n, fc_w.shape[1]), jnp.float32),
      in_specs=[_VMEM_FULL, _VMEM_FULL, _VMEM_FULL],
      out_specs=_VMEM_FULL,
      compiler_params=_cp(None),
  )(x.reshape(n, h * w, c), fc_w, fc_b)


# ----------------------------------------------------------------------------
# Parameter init (deterministic, synthetic; channels padded to 128 lanes)
# ----------------------------------------------------------------------------
def init_conv(key, cout, cin, k, *, pad_cin=True):
  cin_p = _cpad(cin) if pad_cin else cin
  cout_p = _cpad(cout)
  real = (jax.random.normal(key, (k, k, cin, cout), jnp.float32)
          / math.sqrt(cin * k * k))
  w = jnp.zeros((k, k, cin_p, cout_p), jnp.float32)
  w = w.at[:, :, :cin, :cout].set(real)
  return w.astype(jnp.bfloat16)


def init_bn(key, c):
  c_p = _cpad(c)
  k1, k2 = jax.random.split(key)
  gamma = jnp.ones((1, c_p), jnp.float32)
  beta = jnp.zeros((1, c_p), jnp.float32)  # padded channels stay exactly zero
  gamma = gamma.at[0, :c].set(1.0 + 0.1 * jax.random.normal(k1, (c,)))
  beta = beta.at[0, :c].set(0.1 * jax.random.normal(k2, (c,)))
  return {"gamma": gamma, "beta": beta}


def init_bottleneck(key, in_c, planes, stride, downsample):
  ks = jax.random.split(key, 8)
  p = {
      "conv1": init_conv(ks[0], planes, in_c, 1),
      "bn1": init_bn(ks[1], planes),
      "conv2": init_conv(ks[2], planes, planes, 3),
      "bn2": init_bn(ks[3], planes),
      "conv3": init_conv(ks[4], planes * EXPANSION, planes, 1),
      "bn3": init_bn(ks[5], planes * EXPANSION),
      "stride": stride,
  }
  if downsample:
    p["down_conv"] = init_conv(ks[6], planes * EXPANSION, in_c, 1)
    p["down_bn"] = init_bn(ks[7], planes * EXPANSION)
  return p


def init_resnet(key, layer_list, num_classes, num_channels=3):
  params = {
      "conv1": init_conv(jax.random.fold_in(key, 0), 64, num_channels, 3,
                         pad_cin=False),
      "bn1": init_bn(jax.random.fold_in(key, 1), 64),
      "num_classes": num_classes,
  }
  in_c = 64
  layers = []
  kidx = 2
  for blocks, planes, stride in zip(layer_list, (64, 128, 256, 512),
                                    (1, 2, 2, 2)):
    blk_params = []
    for b in range(blocks):
      s = stride if b == 0 else 1
      need_down = (b == 0) and (s != 1 or in_c != planes * EXPANSION)
      blk_params.append(init_bottleneck(jax.random.fold_in(key, kidx),
                                        in_c, planes, s, need_down))
      kidx += 1
      in_c = planes * EXPANSION
    layers.append(blk_params)
  params["layers"] = layers
  kf1, kf2 = jax.random.split(jax.random.fold_in(key, 1000))
  ncp = _cpad(num_classes)
  fc_w = jnp.zeros((512 * EXPANSION, ncp), jnp.float32)
  fc_w = fc_w.at[:, :num_classes].set(
      jax.random.normal(kf1, (512 * EXPANSION, num_classes), jnp.float32)
      / math.sqrt(512 * EXPANSION))
  fc_b = jnp.zeros((1, ncp), jnp.float32)
  fc_b = fc_b.at[0, :num_classes].set(
      0.01 * jax.random.normal(kf2, (num_classes,), jnp.float32))
  params["fc_w"] = fc_w
  params["fc_b"] = fc_b
  return params


# ----------------------------------------------------------------------------
# Forward pass (mirrors ResNet.forward / Bottleneck.forward, training-mode BN)
# ----------------------------------------------------------------------------
def bottleneck_forward(p, x):
  identity = x
  y = conv_bn_act(x, p["conv1"], p["bn1"], stride=1, pad=0, relu=True)
  y = conv_bn_act(y, p["conv2"], p["bn2"], stride=p["stride"], pad=1,
                  relu=True)
  if "down_conv" in p:
    identity = conv_bn_act(x, p["down_conv"], p["down_bn"],
                           stride=p["stride"], pad=0, relu=False)
  # conv3 + BN3 + residual add + ReLU (residual/ReLU fused in the BN kernel).
  y = conv_bn_act(y, p["conv3"], p["bn3"], stride=1, pad=0, relu=True,
                  residual=identity)
  return y


def resnet_forward(params, x_nchw):
  x = jnp.transpose(x_nchw, (0, 2, 3, 1)).astype(jnp.bfloat16)  # NCHW -> NHWC
  # stem: conv(k3, s1, p3, bias=False) + BN + ReLU  (as in the spec module)
  x = conv_bn_act(x, params["conv1"], params["bn1"], stride=1, pad=3,
                  relu=True)
  x = maxpool_3x3_s2_p1(x)
  for blk_params in params["layers"]:
    for bp in blk_params:
      x = bottleneck_forward(bp, x)
  logits = avgpool_fc(x, params["fc_w"], params["fc_b"])
  return logits[:, :params["num_classes"]]


if __name__ == "__main__":
  key = jax.random.PRNGKey(0)
  kx, kp = jax.random.split(key)

  # Small, module-consistent shapes: batch=2, 3 input channels, 16x16 image.
  x = jax.random.normal(kx, (2, 3, 16, 16), jnp.float32)  # NCHW like PyTorch

  # TODO(synk): set layer_list=[3, 4, 6, 3] for the full ResNet50 depth.
  layer_list = [1, 1, 1, 1]
  num_classes = 10
  params = init_resnet(kp, layer_list, num_classes, num_channels=3)

  logits = resnet_forward(params, x)
  logits = jax.block_until_ready(logits)
  assert logits.shape == (2, num_classes)
  assert bool(jnp.all(jnp.isfinite(logits)))
  print("KERNEL_OK")
</pallas_src>

<mosaic_0001>
module attributes {stable_mosaic.version = 11 : i64} {
  func.func @_matmul_kernel(%arg0: i32, %arg1: i32, %arg2: i32, %arg3: memref<512x32xbf16, #tpu.memory_space<vmem>>, %arg4: memref<32x128xbf16, #tpu.memory_space<vmem>>, %arg5: memref<512x128xbf16, #tpu.memory_space<vmem>>, %arg6: memref<512x128xf32, #tpu.memory_space<vmem>>) attributes {dimension_semantics = [#tpu.dimension_semantics<parallel>, #tpu.dimension_semantics<parallel>, #tpu.dimension_semantics<arbitrary>], iteration_bounds = array<i64: 2, 1, 1>, scalar_prefetch = 0 : i64, scratch_operands = 1 : i64, tpu.core_type = #tpu.core_type<tc>, window_params = [{transform_indices = @transform_0, window_bounds = array<i64: 512, 32>}, {transform_indices = @transform_1, window_bounds = array<i64: 32, 128>}, {transform_indices = @transform_2, window_bounds = array<i64: 512, 128>}]} {
    %c0_i32 = arith.constant 0 : i32
    %0 = arith.cmpi eq, %arg2, %c0_i32 : i32
    %1 = arith.extui %0 : i1 to i32
    %c0_i32_0 = arith.constant 0 : i32
    %2 = arith.cmpi ne, %1, %c0_i32_0 : i32
    scf.if %2 {
      %cst_10 = arith.constant 0.000000e+00 : f32
      %12 = vector.broadcast %cst_10 : f32 to vector<512x128xf32>
      %c0_11 = arith.constant 0 : index
      %c0_12 = arith.constant 0 : index
      %13 = vector.load %arg6[%c0_11, %c0_12] : memref<512x128xf32, #tpu.memory_space<vmem>>, vector<512x128xf32>
      tpu.vector_store %arg6[%c0_11, %c0_12], %12 {strides = array<i32>} : memref<512x128xf32, #tpu.memory_space<vmem>>, vector<512x128xf32>,
    } else {
    }
    %c0 = arith.constant 0 : index
    %c0_1 = arith.constant 0 : index
    %3 = vector.load %arg6[%c0, %c0_1] : memref<512x128xf32, #tpu.memory_space<vmem>>, vector<512x128xf32>
    %c0_2 = arith.constant 0 : index
    %c0_3 = arith.constant 0 : index
    %4 = vector.load %arg3[%c0_2, %c0_3] : memref<512x32xbf16, #tpu.memory_space<vmem>>, vector<512x32xbf16>
    %c0_4 = arith.constant 0 : index
    %c0_5 = arith.constant 0 : index
    %5 = vector.load %arg4[%c0_4, %c0_5] : memref<32x128xbf16, #tpu.memory_space<vmem>>, vector<32x128xbf16>
    %cst = arith.constant dense<0.000000e+00> : vector<512x128xf32>
    %6 = tpu.matmul %4, %5, %cst {dimension_numbers = #tpu.dot_dimension_numbers<[1], [0], [0], [1], [0, 0, 1, 1], [], []>} : vector<512x32xbf16>, vector<32x128xbf16>, vector<512x128xf32> -> vector<512x128xf32>
    %7 = arith.addf %3, %6 : vector<512x128xf32>
    %c0_6 = arith.constant 0 : index
    %c0_7 = arith.constant 0 : index
    %8 = vector.load %arg6[%c0_6, %c0_7] : memref<512x128xf32, #tpu.memory_space<vmem>>, vector<512x128xf32>
    tpu.vector_store %arg6[%c0_6, %c0_7], %7 {strides = array<i32>} : memref<512x128xf32, #tpu.memory_space<vmem>>, vector<512x128xf32>,
    %c0_i32_8 = arith.constant 0 : i32
    %9 = arith.cmpi eq, %arg2, %c0_i32_8 : i32
    %10 = arith.extui %9 : i1 to i32
    %c0_i32_9 = arith.constant 0 : i32
    %11 = arith.cmpi ne, %10, %c0_i32_9 : i32
    scf.if %11 {
      %c0_10 = arith.constant 0 : index
      %c0_11 = arith.constant 0 : index
      %12 = vector.load %arg6[%c0_10, %c0_11] : memref<512x128xf32, #tpu.memory_space<vmem>>, vector<512x128xf32>
      %13 = arith.truncf %12 : vector<512x128xf32> to vector<512x128xbf16>
      %c0_12 = arith.constant 0 : index
      %c0_13 = arith.constant 0 : index
      %14 = vector.load %arg5[%c0_12, %c0_13] : memref<512x128xbf16, #tpu.memory_space<vmem>>, vector<512x128xbf16>
      tpu.vector_store %arg5[%c0_12, %c0_13], %13 {strides = array<i32>} : memref<512x128xbf16, #tpu.memory_space<vmem>>, vector<512x128xbf16>,
    } else {
    }
    return
  }
  func.func @transform_0(%arg0: i32, %arg1: i32, %arg2: i32) -> (i32, i32) {
    %c0_i32 = arith.constant 0 : i32
    return %arg0, %arg2 : i32, i32
  }
  func.func @transform_1(%arg0: i32, %arg1: i32, %arg2: i32) -> (i32, i32) {
    %c0_i32 = arith.constant 0 : i32
    return %arg2, %arg1 : i32, i32
  }
  func.func @transform_2(%arg0: i32, %arg1: i32, %arg2: i32) -> (i32, i32) {
    %c0_i32 = arith.constant 0 : i32
    return %arg0, %arg1 : i32, i32
  }
}

</mosaic_0001>

<bundles_post_ra>
// kernel: tpu_custom_call.1
= control target key start
LH: loop header
LB: loop body
LE: loop exit
PB: predicated region body
PF: predicated region fallthrough
CT: control target
= control target key end

     0   :  { %7 = vsyncpa [#allocation4], 0  ;;  %s2060_s0 = inlined_call_operand.vmem [shape: bf16[1024,32], index: 0, kind: input, shape index: {}]   ;;  %s2061_s1 = inlined_call_operand.vmem [shape: bf16[32,128], index: 1, kind: input, shape index: {}]   ;;  %s2062_s2 = inlined_call_operand.hbm [shape: bf16[1024,128], index: 2, kind: output, shape index: {}]  }
   0x1   :  { %9 = vsyncpa [#allocation4 + $0x1], 0  ;;  %s1853_s9 = smov 0   ;;  %s1855_s10 = smov 0  }
   0x2   :  { %s1857_s11 = smov 0   ;;  %s1859_s12 = smov 0  }
   0x3   :  { %s1861_s13 = smov 0   ;;  %s1863_s14 = smov 0  }
   0x4 LB: > { %s1285_s15 = sadd.s32 4294967295, %s1834_s14   ;;  %s1286_s16 = sadd.s32 4294967294, %s1834_s14   ;;  %s1834_s14 = sphi %s1863_s14, %s15_s14   ;;  %s1830_s13 = sphi %s1861_s13, %s2069_s13   ;;  %s1826_s12 = sphi %s1859_s12, %s2068_s12   ;;  %s1822_s11 = sphi %s1857_s11, %s2067_s11   ;;  %s1818_s10 = sphi %s1855_s10, %s2066_s10   ;;  %s1814_s9 = sphi %s1853_s9, %s2065_s9  }
   0x5   : > { %s34_s17 = sadd.s32 1, %s1830_s13  ;;  %s99_s18 = sadd.s32 1, %s1822_s11 }
   0x6   : > { %p36_p0 = scmp.ge.s32.totalorder %s34_s17, 2  ;;  %p109_p1 = scmp.ne.s32.totalorder %s1822_s11, %s1818_s10 }
   0x7   : > { %p110_p2 = scmp.eq.s32.totalorder %s1285_s15, 1  ;;  %p115_p3 = scmp.ne.s32.totalorder %s1818_s10, %s1814_s9 }
   0x8   : > { %s2071_s17 = smov (%p36_p0, %s34_s17), 0  ;;  %p116_p5 = scmp.eq.s32.totalorder %s1286_s16, 1 }
   0x9   : > { %p1893_p4 = por %p110_p2, %p109_p1  ;;  %s94_s20 = ssub.s32 %s1830_s13, %s2071_s17 }
   0xa   : > { %p1290_p6 = scmp.ge.s32.totalorder %s1834_s14, 1  ;;  %p97_p7 = scmp.eq.s32.totalorder %s94_s20, 0 }
   0xb   : > { %p1900_p8 = por %p116_p5, %p115_p3  ;;  %p158_p9 = scmp.lt.s32.totalorder %s1834_s14, 3 }
   0xc   : > { %s1906_s22 = scalar_select %p97_p7, %s1822_s11, %s99_s18  }
   0xd   : > { %p159_p10 = pnand %p1290_p6, %p158_p9 }
   0xe   : > { %s1292_s25 = sshll.u32 (!%p159_p10), %s1826_s12, 6  ;;  %s188_s4 = sand.u32 (!%p159_p10), 1, %s1818_s10  }
   0xf   : > { %162 = sbr.rel (%p159_p10) target bundleno = 288 (0x120), region = 28  ;;  %p192_p11 = scmp.lt.s32.totalorder (!%p159_p10), %s1292_s25, 127 }
  0x10   : > { %s1291_s5 = sshll.u32 (!%p159_p10), %s188_s4, 8  ;;  %s1501_s7 = sshll.u32 (!%p159_p10), %s1826_s12, 8 }
  0x11   : > { %s1987_s6 = scalar_lea.vmem (!%p159_p10), [#allocation3], %s1291_s5  ;;  %s1185_s16 = scalar_lea.hbm (!%p159_p10), %s2062_s2, %s1501_s7 }
  0x12   : > { %s1186_s18 = sshll.u32 (!%p159_p10), %s1987_s6, 4  ;;  %s1188_s20 = sshll.u32 (!%p159_p10), %s1185_s16, 4  ;;  %s1187_s18 = int_to_ptr.vmem [resolvable:$true] %s1186_s18  ;;  %s1189_s20 = int_to_ptr.hbm [resolvable:$true] %s1188_s20 }
  0x13   : > { %s1173_s12 = scalar_lea.sflag (!%p159_p10), [#allocation4], %s188_s4  ;;  %s1770_s23 = sshra.s32 (!%p159_p10), %s1189_s20, 4  ;;  %s1771_s23 = int_to_ptr.hbm [resolvable:$true] %s1770_s23 }
  0x14   : > { %v1500_v0 = vld [vmem:[%s2061_s1 + $0x8] sm:$0xff]  ;;  %v1499_v1 = vld [vmem:[%s2061_s1] sm:$0xff]  ;;  %s2073_s25 = smov (!%p192_p11, %s1292_s25), 127  ;;  %vm583_vm0 = vcmask 261120   ;;  %s1772_s24 = scalar_lea.hbm %s1771_s23, 256 }
  0x15   : > { %686 = vmatpush.bf16.msra.mxu0 %v1500_v0  ;;  %1693 = vmatpush.bf16.msra.mxu1 %v1500_v0  ;;  %s1293_s28 = sshll.u32 %s2073_s25, 2  ;;  %p1773_p12 = scmp.ne.s32.totalorder %s1771_s23, %s1772_s24 }
  0x16   : > { %1694 = vmatpush.bf16.msra.mxu2 %v1500_v0  ;;  %1695 = vmatpush.bf16.msra.mxu3 %v1500_v0  ;;  %s1918_s3 = scalar_lea.vmem %s2060_s0, %s1293_s28  ;;  %s1776_s27 = scalar_lea.hbm %s2062_s2, 512 }
  0x17   : > { %v1467_v2 = vld [vmem:[%s1918_s3] sm:$0xff]  ;;  %v1468_v6 = vld [vmem:[%s1918_s3 + $0x8] sm:$0xff]  ;;  %v1469_v10 = vld [vmem:[%s1918_s3 + $0x10] sm:$0xff]  ;;  %p1774_p13 = pnand %p1773_p12, %p1893_p4  ;;  %p1777_p1 = scmp.lt.s32.totalorder %s1771_s23, %s2062_s2 }
  0x18   : > { %v1475_v3 = vld [vmem:[%s1918_s3 + $0x40] sm:$0xff]  ;;  %v1476_v7 = vld [vmem:[%s1918_s3 + $0x48] sm:$0xff]  ;;  %v1477_v11 = vld [vmem:[%s1918_s3 + $0x50] sm:$0xff]  ;;  %p1778_p2 = scmp.lt.s32.totalorder %s1776_s27, %s1772_s24 }
  0x19   : > { %687 = vmatpush.bf16.msra.mxu0 %v1499_v1  ;;  %1696 = vmatpush.bf16.msra.mxu1 %v1499_v1  ;;  %v1483_v4 = vld [vmem:[%s1918_s3 + $0x80] sm:$0xff]  ;;  %v1484_v8 = vld [vmem:[%s1918_s3 + $0x88] sm:$0xff]  ;;  %v1485_v12 = vld [vmem:[%s1918_s3 + $0x90] sm:$0xff]  ;;  %p1775_p0 = pneg %p1774_p13 }
  0x1a   : > { %1697 = vmatpush.bf16.msra.mxu2 %v1499_v1  ;;  %1698 = vmatpush.bf16.msra.mxu3 %v1499_v1  ;;  %v1491_v5 = vld [vmem:[%s1918_s3 + $0xc0] sm:$0xff]  ;;  %v1492_v9 = vld [vmem:[%s1918_s3 + $0xc8] sm:$0xff]  ;;  %v1493_v13 = vld [vmem:[%s1918_s3 + $0xd0] sm:$0xff]  ;;  %p1779_p3 = por %p1778_p2, %p1777_p1 }
  0x1b   : > { %v1470_v14 = vld [vmem:[%s1918_s3 + $0x18] sm:$0xff]  ;;  %v1471_v18 = vld [vmem:[%s1918_s3 + $0x20] sm:$0xff]  ;;  %v1472_v22 = vld [vmem:[%s1918_s3 + $0x28] sm:$0xff] }
  0x1c   : > { %1430 = vmatmul.msk.bf16.vlgmr.msra.gmra.mxu0 %vm583_vm0, %v1467_v2  ;;  %1438 = vmatmul.msk.bf16.vlgmr.msra.gmra.mxu1 %vm583_vm0, %v1475_v3  ;;  %v1478_v15 = vld [vmem:[%s1918_s3 + $0x58] sm:$0xff]  ;;  %v1479_v19 = vld [vmem:[%s1918_s3 + $0x60] sm:$0xff]  ;;  %v1480_v23 = vld [vmem:[%s1918_s3 + $0x68] sm:$0xff]  ;;  %p1780_p5 = pnand %p1779_p3, %p1775_p0 }
  0x1d   : > { %1446 = vmatmul.msk.bf16.vlgmr.msra.gmra.mxu2 %vm583_vm0, %v1483_v4  ;;  %1454 = vmatmul.msk.bf16.vlgmr.msra.gmra.mxu3 %vm583_vm0, %v1491_v5  ;;  %v1486_v16 = vld [vmem:[%s1918_s3 + $0x98] sm:$0xff]  ;;  %v1487_v20 = vld [vmem:[%s1918_s3 + $0xa0] sm:$0xff]  ;;  %v1488_v24 = vld [vmem:[%s1918_s3 + $0xa8] sm:$0xff] }
  0x1e   : > { %v1494_v17 = vld [vmem:[%s1918_s3 + $0xd8] sm:$0xff]  ;;  %v1495_v21 = vld [vmem:[%s1918_s3 + $0xe0] sm:$0xff]  ;;  %v1496_v25 = vld [vmem:[%s1918_s3 + $0xe8] sm:$0xff] }
  0x1f   : > { %v1473_v26 = vld [vmem:[%s1918_s3 + $0x30] sm:$0xff]  ;;  %v1474_v30 = vld [vmem:[%s1918_s3 + $0x38] sm:$0xff] }
  0x20   : > { %v1481_v27 = vld [vmem:[%s1918_s3 + $0x70] sm:$0xff]  ;;  %v1482_v31 = vld [vmem:[%s1918_s3 + $0x78] sm:$0xff] }
  0x21   : > { %v1489_v28 = vld [vmem:[%s1918_s3 + $0xb0] sm:$0xff]  ;;  %v1490_v32 = vld [vmem:[%s1918_s3 + $0xb8] sm:$0xff] }
  0x22   : > { %v1497_v29 = vld [vmem:[%s1918_s3 + $0xf0] sm:$0xff]  ;;  %v1498_v33 = vld [vmem:[%s1918_s3 + $0xf8] sm:$0xff] }
  0x2c   : > { %1431 = vmatmul.msk.bf16.gmra.mxu0 %vm583_vm0, %v1468_v6  ;;  %1439 = vmatmul.msk.bf16.gmra.mxu1 %vm583_vm0, %v1476_v7 }
  0x2d   : > { %1447 = vmatmul.msk.bf16.gmra.mxu2 %vm583_vm0, %v1484_v8  ;;  %1455 = vmatmul.msk.bf16.gmra.mxu3 %vm583_vm0, %v1492_v9 }
  0x3c   : > { %1432 = vmatmul.msk.bf16.gmra.mxu0 %vm583_vm0, %v1469_v10  ;;  %1440 = vmatmul.msk.bf16.gmra.mxu1 %vm583_vm0, %v1477_v11 }
  0x3d   : > { %1448 = vmatmul.msk.bf16.gmra.mxu2 %vm583_vm0, %v1485_v12  ;;  %1456 = vmatmul.msk.bf16.gmra.mxu3 %vm583_vm0, %v1493_v13 }
  0x4c   : > { %1433 = vmatmul.msk.bf16.gmra.mxu0 %vm583_vm0, %v1470_v14  ;;  %1441 = vmatmul.msk.bf16.gmra.mxu1 %vm583_vm0, %v1478_v15 }
  0x4d   : > { %1449 = vmatmul.msk.bf16.gmra.mxu2 %vm583_vm0, %v1486_v16  ;;  %1457 = vmatmul.msk.bf16.gmra.mxu3 %vm583_vm0, %v1494_v17 }
  0x5c   : > { %1434 = vmatmul.msk.bf16.gmra.mxu0 %vm583_vm0, %v1471_v18  ;;  %1442 = vmatmul.msk.bf16.gmra.mxu1 %vm583_vm0, %v1479_v19 }
  0x5d   : > { %1450 = vmatmul.msk.bf16.gmra.mxu2 %vm583_vm0, %v1487_v20  ;;  %1458 = vmatmul.msk.bf16.gmra.mxu3 %vm583_vm0, %v1495_v21 }
  0x6c   : > { %1435 = vmatmul.msk.bf16.gmra.mxu0 %vm583_vm0, %v1472_v22  ;;  %1443 = vmatmul.msk.bf16.gmra.mxu1 %vm583_vm0, %v1480_v23 }
  0x6d   : > { %1451 = vmatmul.msk.bf16.gmra.mxu2 %vm583_vm0, %v1488_v24  ;;  %1459 = vmatmul.msk.bf16.gmra.mxu3 %vm583_vm0, %v1496_v25 }
  0x7c   : > { %1436 = vmatmul.msk.bf16.gmra.mxu0 %vm583_vm0, %v1473_v26  ;;  %1444 = vmatmul.msk.bf16.gmra.mxu1 %vm583_vm0, %v1481_v27 }
  0x7d   : > { %1452 = vmatmul.msk.bf16.gmra.mxu2 %vm583_vm0, %v1489_v28  ;;  %1460 = vmatmul.msk.bf16.gmra.mxu3 %vm583_vm0, %v1497_v29 }
  0x8c   : > { %1437 = vmatmul.msk.bf16.gmra.mxu0 %vm583_vm0, %v1474_v30  ;;  %1445 = vmatmul.msk.bf16.gmra.mxu1 %vm583_vm0, %v1482_v31 }
  0x8d   : > { %1453 = vmatmul.msk.bf16.gmra.mxu2 %vm583_vm0, %v1490_v32  ;;  %1461 = vmatmul.msk.bf16.gmra.mxu3 %vm583_vm0, %v1498_v33 }
  0x99   : > { %v689_v34 = vpop.f32.mrf.mxu0  ;;  %v729_v35 = vpop.f32.mrf.mxu1 }
  0xa0   : > { %v769_v36 = vpop.f32.mrf.mxu2  ;;  %v809_v37 = vpop.f32.mrf.mxu3 }
  0xa1   : > { %v691_v38 = vpop.f32.mrf.mxu0  ;;  %v731_v39 = vpop.f32.mrf.mxu1 }
  0xa2   : > { %v1505_v40 = vpack.c.bf16 %v691_v38, %v689_v34  ;;  %v1545_v41 = vpack.c.bf16 %v731_v39, %v729_v35 }
  0xa4   : > { %1506 = vst [vmem:[%s1987_s6] sm:$0xff] %v1505_v40  }
  0xa5   : > { %1669 = vst [vmem:[%s1987_s6 + $0x40] sm:$0xff] %v1545_v41  }
  0xa8   : > { %v771_v42 = vpop.f32.mrf.mxu2  ;;  %v811_v43 = vpop.f32.mrf.mxu3 }
  0xa9   : > { %v1585_v44 = vpack.c.bf16 %v771_v42, %v769_v36  ;;  %v1625_v45 = vpack.c.bf16 %v811_v43, %v809_v37  ;;  %v694_v46 = vpop.f32.mrf.mxu0  ;;  %v734_v47 = vpop.f32.mrf.mxu1 }
  0xab   : > { %1677 = vst [vmem:[%s1987_s6 + $0x80] sm:$0xff] %v1585_v44  }
  0xac   : > { %1685 = vst [vmem:[%s1987_s6 + $0xc0] sm:$0xff] %v1625_v45  }
  0xb0   : > { %v774_v48 = vpop.f32.mrf.mxu2  ;;  %v814_v49 = vpop.f32.mrf.mxu3 }
  0xb1   : > { %v696_v50 = vpop.f32.mrf.mxu0  ;;  %v736_v51 = vpop.f32.mrf.mxu1 }
  0xb2   : > { %v1510_v52 = vpack.c.bf16 %v696_v50, %v694_v46  ;;  %v1550_v53 = vpack.c.bf16 %v736_v51, %v734_v47 }
  0xb4   : > { %1662 = vst [vmem:[%s1987_s6 + $0x8] sm:$0xff] %v1510_v52  }
  0xb5   : > { %1670 = vst [vmem:[%s1987_s6 + $0x48] sm:$0xff] %v1550_v53  }
  0xb8   : > { %v776_v54 = vpop.f32.mrf.mxu2  ;;  %v816_v55 = vpop.f32.mrf.mxu3 }
  0xb9   : > { %v1590_v56 = vpack.c.bf16 %v776_v54, %v774_v48  ;;  %v1630_v57 = vpack.c.bf16 %v816_v55, %v814_v49  ;;  %v699_v58 = vpop.f32.mrf.mxu0  ;;  %v739_v59 = vpop.f32.mrf.mxu1 }
  0xbb   : > { %1678 = vst [vmem:[%s1987_s6 + $0x88] sm:$0xff] %v1590_v56  }
  0xbc   : > { %1686 = vst [vmem:[%s1987_s6 + $0xc8] sm:$0xff] %v1630_v57  }
  0xc0   : > { %v779_v60 = vpop.f32.mrf.mxu2  ;;  %v819_v61 = vpop.f32.mrf.mxu3 }
  0xc1   : > { %v701_v62 = vpop.f32.mrf.mxu0  ;;  %v741_v63 = vpop.f32.mrf.mxu1 }
  0xc2   : > { %v1515_v0 = vpack.c.bf16 %v701_v62, %v699_v58  ;;  %v1555_v1 = vpack.c.bf16 %v741_v63, %v739_v59 }
  0xc4   : > { %1663 = vst [vmem:[%s1987_s6 + $0x10] sm:$0xff] %v1515_v0  }
  0xc5   : > { %1671 = vst [vmem:[%s1987_s6 + $0x50] sm:$0xff] %v1555_v1  }
  0xc8   : > { %v781_v2 = vpop.f32.mrf.mxu2  ;;  %v821_v3 = vpop.f32.mrf.mxu3 }
  0xc9   : > { %v1595_v4 = vpack.c.bf16 %v781_v2, %v779_v60  ;;  %v1635_v5 = vpack.c.bf16 %v821_v3, %v819_v61  ;;  %v704_v6 = vpop.f32.mrf.mxu0  ;;  %v744_v7 = vpop.f32.mrf.mxu1 }
  0xcb   : > { %1679 = vst [vmem:[%s1987_s6 + $0x90] sm:$0xff] %v1595_v4  }
  0xcc   : > { %1687 = vst [vmem:[%s1987_s6 + $0xd0] sm:$0xff] %v1635_v5  }
  0xd0   : > { %v784_v8 = vpop.f32.mrf.mxu2  ;;  %v824_v9 = vpop.f32.mrf.mxu3 }
  0xd1   : > { %v706_v10 = vpop.f32.mrf.mxu0  ;;  %v746_v11 = vpop.f32.mrf.mxu1 }
  0xd2   : > { %v1520_v12 = vpack.c.bf16 %v706_v10, %v704_v6  ;;  %v1560_v13 = vpack.c.bf16 %v746_v11, %v744_v7 }
  0xd4   : > { %1664 = vst [vmem:[%s1987_s6 + $0x18] sm:$0xff] %v1520_v12  }
  0xd5   : > { %1672 = vst [vmem:[%s1987_s6 + $0x58] sm:$0xff] %v1560_v13  }
  0xd8   : > { %v786_v14 = vpop.f32.mrf.mxu2  ;;  %v826_v15 = vpop.f32.mrf.mxu3 }
  0xd9   : > { %v1600_v16 = vpack.c.bf16 %v786_v14, %v784_v8  ;;  %v1640_v17 = vpack.c.bf16 %v826_v15, %v824_v9  ;;  %v709_v18 = vpop.f32.mrf.mxu0  ;;  %v749_v19 = vpop.f32.mrf.mxu1 }
  0xdb   : > { %1680 = vst [vmem:[%s1987_s6 + $0x98] sm:$0xff] %v1600_v16  }
  0xdc   : > { %1688 = vst [vmem:[%s1987_s6 + $0xd8] sm:$0xff] %v1640_v17  }
  0xe0   : > { %v789_v20 = vpop.f32.mrf.mxu2  ;;  %v829_v21 = vpop.f32.mrf.mxu3 }
  0xe1   : > { %v711_v22 = vpop.f32.mrf.mxu0  ;;  %v751_v23 = vpop.f32.mrf.mxu1 }
  0xe2   : > { %v1525_v24 = vpack.c.bf16 %v711_v22, %v709_v18  ;;  %v1565_v25 = vpack.c.bf16 %v751_v23, %v749_v19 }
  0xe4   : > { %1665 = vst [vmem:[%s1987_s6 + $0x20] sm:$0xff] %v1525_v24  }
  0xe5   : > { %1673 = vst [vmem:[%s1987_s6 + $0x60] sm:$0xff] %v1565_v25  }
  0xe8   : > { %v791_v26 = vpop.f32.mrf.mxu2  ;;  %v831_v27 = vpop.f32.mrf.mxu3 }
  0xe9   : > { %v1605_v28 = vpack.c.bf16 %v791_v26, %v789_v20  ;;  %v1645_v29 = vpack.c.bf16 %v831_v27, %v829_v21  ;;  %v714_v30 = vpop.f32.mrf.mxu0  ;;  %v754_v31 = vpop.f32.mrf.mxu1 }
  0xeb   : > { %1681 = vst [vmem:[%s1987_s6 + $0xa0] sm:$0xff] %v1605_v28  }
  0xec   : > { %1689 = vst [vmem:[%s1987_s6 + $0xe0] sm:$0xff] %v1645_v29  }
  0xf0   : > { %v794_v32 = vpop.f32.mrf.mxu2  ;;  %v834_v33 = vpop.f32.mrf.mxu3 }
  0xf1   : > { %v716_v34 = vpop.f32.mrf.mxu0  ;;  %v756_v35 = vpop.f32.mrf.mxu1 }
  0xf2   : > { %v1530_v36 = vpack.c.bf16 %v716_v34, %v714_v30  ;;  %v1570_v37 = vpack.c.bf16 %v756_v35, %v754_v31 }
  0xf4   : > { %1666 = vst [vmem:[%s1987_s6 + $0x28] sm:$0xff] %v1530_v36  }
  0xf5   : > { %1674 = vst [vmem:[%s1987_s6 + $0x68] sm:$0xff] %v1570_v37  }
  0xf8   : > { %v796_v38 = vpop.f32.mrf.mxu2  ;;  %v836_v39 = vpop.f32.mrf.mxu3 }
  0xf9   : > { %v1610_v40 = vpack.c.bf16 %v796_v38, %v794_v32  ;;  %v1650_v41 = vpack.c.bf16 %v836_v39, %v834_v33  ;;  %v719_v42 = vpop.f32.mrf.mxu0  ;;  %v759_v43 = vpop.f32.mrf.mxu1 }
  0xfb   : > { %1682 = vst [vmem:[%s1987_s6 + $0xa8] sm:$0xff] %v1610_v40  }
  0xfc   : > { %1690 = vst [vmem:[%s1987_s6 + $0xe8] sm:$0xff] %v1650_v41  }
 0x100   : > { %v799_v44 = vpop.f32.mrf.mxu2  ;;  %v839_v45 = vpop.f32.mrf.mxu3 }
 0x101   : > { %v721_v46 = vpop.f32.mrf.mxu0  ;;  %v761_v47 = vpop.f32.mrf.mxu1 }
 0x102   : > { %v1535_v48 = vpack.c.bf16 %v721_v46, %v719_v42  ;;  %v1575_v49 = vpack.c.bf16 %v761_v47, %v759_v43 }
 0x104   : > { %1667 = vst [vmem:[%s1987_s6 + $0x30] sm:$0xff] %v1535_v48  }
 0x105   : > { %1675 = vst [vmem:[%s1987_s6 + $0x70] sm:$0xff] %v1575_v49  }
 0x108   : > { %v801_v50 = vpop.f32.mrf.mxu2  ;;  %v841_v51 = vpop.f32.mrf.mxu3 }
 0x109   : > { %v1615_v52 = vpack.c.bf16 %v801_v50, %v799_v44  ;;  %v1655_v53 = vpack.c.bf16 %v841_v51, %v839_v45  ;;  %v724_v54 = vpop.f32.mrf.mxu0  ;;  %v764_v55 = vpop.f32.mrf.mxu1 }
 0x10b   : > { %1683 = vst [vmem:[%s1987_s6 + $0xb0] sm:$0xff] %v1615_v52  }
 0x10c   : > { %1691 = vst [vmem:[%s1987_s6 + $0xf0] sm:$0xff] %v1655_v53  }
 0x110   : > { %v804_v56 = vpop.f32.mrf.mxu2  ;;  %v844_v57 = vpop.f32.mrf.mxu3 }
 0x111   : > { %v726_v58 = vpop.f32.mrf.mxu0  ;;  %v766_v59 = vpop.f32.mrf.mxu1 }
 0x112   : > { %v1540_v60 = vpack.c.bf16 %v726_v58, %v724_v54  ;;  %v1580_v61 = vpack.c.bf16 %v766_v59, %v764_v55 }
 0x114   : > { %1668 = vst [vmem:[%s1987_s6 + $0x38] sm:$0xff] %v1540_v60  }
 0x115   : > { %1676 = vst [vmem:[%s1987_s6 + $0x78] sm:$0xff] %v1580_v61  }
 0x118   : > { %v806_v62 = vpop.f32.mrf.mxu2  ;;  %v846_v63 = vpop.f32.mrf.mxu3 }
 0x119   : > { %v1620_v0 = vpack.c.bf16 %v806_v62, %v804_v56  ;;  %v1660_v1 = vpack.c.bf16 %v846_v63, %v844_v57 }
 0x11b   : > { %1684 = vst [vmem:[%s1987_s6 + $0xb8] sm:$0xff] %v1620_v0  }
 0x11c   : > { %1692 = vst [vmem:[%s1987_s6 + $0xf8] sm:$0xff] %v1660_v1  }
 0x11d   : > { %1783 = shalt.err (!%p1780_p5)
}
 0x11e   : > { %s1836_s30 = smov 64   ;;  %s1837_s3 = smov 4  }
 0x11f   : > { %1699 = dma.vmem_to_hbm [thread:$0]  (%p1893_p4), %s1187_s18, 4096, %s1189_s20, %s1173_s12, %s1836_s30, %s1836_s30, %s1837_s3  }
 0x120 PF: > { %p1705_p6 = scmp.ge.s32.totalorder %s1834_s14, 2  ;;  %s1203_s4 = sand.u32 1, %s1814_s9  }
 0x121   : > { %s1204_s5 = scalar_lea.sflag [#allocation4], %s1203_s4 }
 0x122   : > { %p1702_p7 = pnand %p1705_p6, %p1900_p8 }
 0x124   : > { %p1703_p9 = pneg %p1702_p7 }
 0x126   : > { %1809 = dma.done.wait (%p1703_p9), %s1204_s5, 4096  }
 0x127   : > { %1811 = vsyncadd (%p1703_p9), %s1204_s5, 4294963200  ;;  %s15_s14 = sadd.s32 1, %s1834_s14   ;;  %s2065_s9 = smov %s1818_s10 }
 0x128   : > { %p12_p10 = scmp.ge.s32.totalorder %s15_s14, 4   ;;  %s2066_s10 = smov %s1822_s11 }
 0x129   : > { %s2067_s11 = smov %s1906_s22  ;;  %s2068_s12 = smov %s1830_s13 }
 0x12a   : > { %s2069_s13 = smov %s2071_s17  ;;  %14 = sbr.rel (!%p12_p10) target bundleno = 4 (0x4), region = 74 }
 0x12f   :  { %1210 = vsyncpa [#allocation4], 1 }
 0x130   :  { %1212 = vsyncpa [#allocation4 + $0x1], 1 }

</bundles_post_ra>
